<compile_context>
chip_gen: v7x
topology: tpu7x:2x2x1
jax: 0.10.0
libtpu: 0.0.40
codegen_flags: <defaults>
</compile_context>

<pallas_src>
import functools

import jax
import jax.numpy as jnp
from jax.experimental import pallas as pl
from jax.experimental.pallas import tpu as pltpu


def _round_up(x, m):
    return ((x + m - 1) // m) * m


def _lista_kernel(lam_ref, w_ref, s_ref, y_ref, o_ref, *,
                  num_layers, use_bf16_matmul):
    # lam_ref: (1, 1) in SMEM; w_ref: (N, M); s_ref: (N, N);
    # y_ref: (M, TB); o_ref: (N, TB)
    lam = lam_ref[0, 0]                     # scalar read from SMEM

    n, tb = o_ref.shape
    # Hoist the lam broadcast once; the unrolled layer loop would otherwise
    # re-emit broadcast_in_dim per iteration (JAX does not CSE it).
    lam_b = jnp.broadcast_to(lam, (n, tb)).astype(jnp.float32)
    neg_lam_b = -lam_b

    def shrink(x):
        # Soft-threshold via clamp: x - clip(x, -lam, lam)   (3 VPU ops,
        # identical to sign(x) * max(|x| - lam, 0)).
        return x - jnp.minimum(jnp.maximum(x, neg_lam_b), lam_b)

    mm_dtype = jnp.bfloat16 if use_bf16_matmul else jnp.float32
    w_mm = w_ref[...].astype(mm_dtype)
    s_mm = s_ref[...].astype(mm_dtype)
    y_mm = y_ref[...].astype(mm_dtype)

    # Wy once per block; recurrence NL times, all state kept in f32.
    wy = jnp.dot(w_mm, y_mm, preferred_element_type=jnp.float32)    # (N, TB)
    z = wy
    for _ in range(num_layers):   # NL is small and static -> unrolled
        a = shrink(z).astype(mm_dtype)
        z = wy + jnp.dot(s_mm, a, preferred_element_type=jnp.float32)
    o_ref[...] = shrink(z).astype(o_ref.dtype)


def _pick_block_b(batch):
    # Wide tiles amortize the ~0.35us per-grid-step overhead and keep output
    # stores lane-dense (multiple of 128), but keep >=2 grid steps whenever
    # possible so the "parallel" batch axis can shard across v7x's 2 TCs.
    if batch <= 128:
        return 128
    half = _round_up(pl.cdiv(batch, 2), 128)
    return min(512, half)


def lista_forward(W, S, lam, Y, *, num_layers, block_b=None,
                  use_bf16_matmul=True):
    """Tied-weight LISTA forward. W:(N,M), S:(N,N), lam scalar, Y:(M,B)."""
    W = jnp.asarray(W, jnp.float32)
    S = jnp.asarray(S, jnp.float32)
    Y = jnp.asarray(Y, jnp.float32)
    N, M = W.shape
    assert S.shape == (N, N)
    My, B = Y.shape
    assert My == M
    lam2d = jnp.asarray(lam, jnp.float32).reshape(1, 1)

    if block_b is None:
        block_b = _pick_block_b(B)          # multiple of 128 (lane-dense)
    B_pad = _round_up(B, block_b)
    if B_pad != B:
        # Zero-pad the batch; zero columns shrink to zero and are sliced off.
        Y = jnp.pad(Y, ((0, 0), (0, B_pad - B)))

    kernel = functools.partial(_lista_kernel, num_layers=num_layers,
                               use_bf16_matmul=use_bf16_matmul)
    out = pl.pallas_call(
        kernel,
        out_shape=jax.ShapeDtypeStruct((N, B_pad), jnp.float32),
        grid_spec=pltpu.PrefetchScalarGridSpec(
            num_scalar_prefetch=0,
            grid=(B_pad // block_b,),
            in_specs=[
                # lam: scalar path (SMEM), no padded VMEM tile / extra DMA.
                pl.BlockSpec(memory_space=pltpu.MemorySpace.SMEM),
                pl.BlockSpec((N, M), lambda i: (0, 0)),        # W, resident
                pl.BlockSpec((N, N), lambda i: (0, 0)),        # S, resident
                pl.BlockSpec((M, block_b), lambda i: (0, i)),  # Y column block
            ],
            out_specs=pl.BlockSpec((N, block_b), lambda i: (0, i)),
        ),
        compiler_params=pltpu.CompilerParams(
            dimension_semantics=("parallel",)),
    )(lam2d, W, S, Y)
    if B_pad != B:
        out = out[:, :B]
    return out


# ----------------------------- pure-JAX reference ---------------------------

def _shrink_ref(x, lam):
    return jnp.sign(x) * jnp.maximum(jnp.abs(x) - lam, 0.0)


def lista_reference(W, S, lam, Y, *, num_layers, mm_dtype=jnp.float32):
    """Reference with optional bf16-operand matmuls (f32 accumulate)."""
    lam = jnp.asarray(lam, jnp.float32).reshape(())
    Wm = jnp.asarray(W, jnp.float32).astype(mm_dtype)
    Sm = jnp.asarray(S, jnp.float32).astype(mm_dtype)
    wy = jnp.dot(Wm, jnp.asarray(Y, jnp.float32).astype(mm_dtype),
                 preferred_element_type=jnp.float32)
    z = wy
    for _ in range(num_layers):
        a = _shrink_ref(z, lam).astype(mm_dtype)
        z = wy + jnp.dot(Sm, a, preferred_element_type=jnp.float32)
    return _shrink_ref(z, lam)


if __name__ == "__main__":
    # Module hyperparameters (szA = (szA_0, szA_1))
    num_layers = 4
    szA_0, szA_1 = 64, 128          # M, N
    batch = 256
    scale_mag = 0.1

    key = jax.random.PRNGKey(0)
    kW, kS, kLam, kY = jax.random.split(key, 4)

    # Deterministic analogue of:  scale_mag * np.random.rand(...)
    W = scale_mag * jax.random.uniform(kW, (szA_1, szA_0), jnp.float32)
    S = scale_mag * jax.random.uniform(kS, (szA_1, szA_1), jnp.float32)
    lam = scale_mag * jax.random.uniform(kLam, (1, 1), jnp.float32)
    Y = jax.random.normal(kY, (szA_0, batch), jnp.float32)

    # 1) f32-operand path vs f32 reference (tight correctness check).
    ref_f32 = lista_reference(W, S, lam, Y, num_layers=num_layers)
    out_f32 = lista_forward(W, S, lam, Y, num_layers=num_layers,
                            use_bf16_matmul=False)
    out_f32 = jax.block_until_ready(out_f32)
    assert out_f32.shape == (szA_1, batch)
    assert jnp.allclose(out_f32, ref_f32, atol=1e-4, rtol=1e-4), (
        float(jnp.max(jnp.abs(out_f32 - ref_f32))))

    # 2) fast bf16-operand path vs matching bf16-operand reference.
    ref_bf16 = lista_reference(W, S, lam, Y, num_layers=num_layers,
                               mm_dtype=jnp.bfloat16)
    out_bf16 = lista_forward(W, S, lam, Y, num_layers=num_layers,
                             use_bf16_matmul=True)
    out_bf16 = jax.block_until_ready(out_bf16)
    assert out_bf16.shape == (szA_1, batch)
    assert jnp.allclose(out_bf16, ref_bf16, atol=1e-2, rtol=1e-3), (
        float(jnp.max(jnp.abs(out_bf16 - ref_bf16))))

    # 3) ragged batch (exercises the padding path instead of the old assert).
    B2 = 200
    Y2 = Y[:, :B2]
    ref2 = lista_reference(W, S, lam, Y2, num_layers=num_layers)
    out2 = lista_forward(W, S, lam, Y2, num_layers=num_layers,
                         use_bf16_matmul=False)
    out2 = jax.block_until_ready(out2)
    assert out2.shape == (szA_1, B2)
    assert jnp.allclose(out2, ref2, atol=1e-4, rtol=1e-4), (
        float(jnp.max(jnp.abs(out2 - ref2))))

    # TODO(synk): untied / 'swish' / 'tanh' variants of the module are not
    # exercised here; the tied-'shrink' forward (the default path) is what the
    # kernel implements.
    print("KERNEL_OK")
</pallas_src>

<mosaic_0001>
module attributes {stable_mosaic.version = 11 : i64} {
  func.func @_lista_kernel(%arg0: i32, %arg1: memref<1x1xf32, #tpu.memory_space<smem>>, %arg2: memref<128x64xf32, #tpu.memory_space<vmem>>, %arg3: memref<128x128xf32, #tpu.memory_space<vmem>>, %arg4: memref<64x128xf32, #tpu.memory_space<vmem>>, %arg5: memref<128x128xf32, #tpu.memory_space<vmem>>) attributes {dimension_semantics = [#tpu.dimension_semantics<parallel>], iteration_bounds = array<i64: 2>, scalar_prefetch = 0 : i64, scratch_operands = 0 : i64, tpu.core_type = #tpu.core_type<tc>, window_params = [{transform_indices = @transform_0, window_bounds = array<i64: 1, 1>}, {pipeline_mode = #tpu.pipeline_mode<synchronous>, transform_indices = @transform_1, window_bounds = array<i64: 128, 64>}, {pipeline_mode = #tpu.pipeline_mode<synchronous>, transform_indices = @transform_2, window_bounds = array<i64: 128, 128>}, {transform_indices = @transform_3, window_bounds = array<i64: 64, 128>}, {transform_indices = @transform_4, window_bounds = array<i64: 128, 128>}]} {
    %c0 = arith.constant 0 : index
    %c0_0 = arith.constant 0 : index
    %0 = memref.load %arg1[%c0, %c0_0] : memref<1x1xf32, #tpu.memory_space<smem>>
    %1 = vector.broadcast %0 : f32 to vector<128x128xf32>
    %cst = arith.constant 0.000000e+00 : f32
    %2 = vector.broadcast %cst : f32 to vector<128x128xf32>
    %3 = arith.subf %2, %1 : vector<128x128xf32>
    %c0_1 = arith.constant 0 : index
    %c0_2 = arith.constant 0 : index
    %4 = vector.load %arg2[%c0_1, %c0_2] : memref<128x64xf32, #tpu.memory_space<vmem>>, vector<128x64xf32>
    %c0_3 = arith.constant 0 : index
    %c0_4 = arith.constant 0 : index
    %5 = vector.load %arg3[%c0_3, %c0_4] : memref<128x128xf32, #tpu.memory_space<vmem>>, vector<128x128xf32>
    %c0_5 = arith.constant 0 : index
    %c0_6 = arith.constant 0 : index
    %6 = vector.load %arg4[%c0_5, %c0_6] : memref<64x128xf32, #tpu.memory_space<vmem>>, vector<64x128xf32>
    %cst_7 = arith.constant dense<0.000000e+00> : vector<128x128xf32>
    %7 = tpu.matmul %4, %6, %cst_7 {dimension_numbers = #tpu.dot_dimension_numbers<[1], [0], [0], [1], [0, 0, 1, 1], [], []>} : vector<128x64xf32>, vector<64x128xf32>, vector<128x128xf32> -> vector<128x128xf32>
    %8 = arith.maximumf %7, %3 : vector<128x128xf32>
    %9 = arith.minimumf %8, %1 : vector<128x128xf32>
    %10 = arith.subf %7, %9 : vector<128x128xf32>
    %cst_8 = arith.constant dense<0.000000e+00> : vector<128x128xf32>
    %11 = tpu.matmul %5, %10, %cst_8 {dimension_numbers = #tpu.dot_dimension_numbers<[1], [0], [0], [1], [0, 0, 1, 1], [], []>} : vector<128x128xf32>, vector<128x128xf32>, vector<128x128xf32> -> vector<128x128xf32>
    %12 = arith.addf %7, %11 : vector<128x128xf32>
    %13 = arith.maximumf %12, %3 : vector<128x128xf32>
    %14 = arith.minimumf %13, %1 : vector<128x128xf32>
    %15 = arith.subf %12, %14 : vector<128x128xf32>
    %cst_9 = arith.constant dense<0.000000e+00> : vector<128x128xf32>
    %16 = tpu.matmul %5, %15, %cst_9 {dimension_numbers = #tpu.dot_dimension_numbers<[1], [0], [0], [1], [0, 0, 1, 1], [], []>} : vector<128x128xf32>, vector<128x128xf32>, vector<128x128xf32> -> vector<128x128xf32>
    %17 = arith.addf %7, %16 : vector<128x128xf32>
    %18 = arith.maximumf %17, %3 : vector<128x128xf32>
    %19 = arith.minimumf %18, %1 : vector<128x128xf32>
    %20 = arith.subf %17, %19 : vector<128x128xf32>
    %cst_10 = arith.constant dense<0.000000e+00> : vector<128x128xf32>
    %21 = tpu.matmul %5, %20, %cst_10 {dimension_numbers = #tpu.dot_dimension_numbers<[1], [0], [0], [1], [0, 0, 1, 1], [], []>} : vector<128x128xf32>, vector<128x128xf32>, vector<128x128xf32> -> vector<128x128xf32>
    %22 = arith.addf %7, %21 : vector<128x128xf32>
    %23 = arith.maximumf %22, %3 : vector<128x128xf32>
    %24 = arith.minimumf %23, %1 : vector<128x128xf32>
    %25 = arith.subf %22, %24 : vector<128x128xf32>
    %cst_11 = arith.constant dense<0.000000e+00> : vector<128x128xf32>
    %26 = tpu.matmul %5, %25, %cst_11 {dimension_numbers = #tpu.dot_dimension_numbers<[1], [0], [0], [1], [0, 0, 1, 1], [], []>} : vector<128x128xf32>, vector<128x128xf32>, vector<128x128xf32> -> vector<128x128xf32>
    %27 = arith.addf %7, %26 : vector<128x128xf32>
    %28 = arith.maximumf %27, %3 : vector<128x128xf32>
    %29 = arith.minimumf %28, %1 : vector<128x128xf32>
    %30 = arith.subf %27, %29 : vector<128x128xf32>
    %c0_12 = arith.constant 0 : index
    %c0_13 = arith.constant 0 : index
    %31 = vector.load %arg5[%c0_12, %c0_13] : memref<128x128xf32, #tpu.memory_space<vmem>>, vector<128x128xf32>
    tpu.vector_store %arg5[%c0_12, %c0_13], %30 {strides = array<i32>} : memref<128x128xf32, #tpu.memory_space<vmem>>, vector<128x128xf32>,
    return
  }
  func.func @transform_0(%arg0: i32) -> (i32, i32) {
    %c0_i32 = arith.constant 0 : i32
    %c0_i32_0 = arith.constant 0 : i32
    %c0_i32_1 = arith.constant 0 : i32
    return %c0_i32, %c0_i32_0 : i32, i32
  }
  func.func @transform_1(%arg0: i32) -> (i32, i32) {
    %c0_i32 = arith.constant 0 : i32
    %c0_i32_0 = arith.constant 0 : i32
    %c0_i32_1 = arith.constant 0 : i32
    return %c0_i32, %c0_i32_0 : i32, i32
  }
  func.func @transform_2(%arg0: i32) -> (i32, i32) {
    %c0_i32 = arith.constant 0 : i32
    %c0_i32_0 = arith.constant 0 : i32
    %c0_i32_1 = arith.constant 0 : i32
    return %c0_i32, %c0_i32_0 : i32, i32
  }
  func.func @transform_3(%arg0: i32) -> (i32, i32) {
    %c0_i32 = arith.constant 0 : i32
    %c0_i32_0 = arith.constant 0 : i32
    return %c0_i32, %arg0 : i32, i32
  }
  func.func @transform_4(%arg0: i32) -> (i32, i32) {
    %c0_i32 = arith.constant 0 : i32
    %c0_i32_0 = arith.constant 0 : i32
    return %c0_i32, %arg0 : i32, i32
  }
}

</mosaic_0001>

<bundles_post_ra>
// kernel: tpu_custom_call.1
= control target key start
LH: loop header
LB: loop body
LE: loop exit
PB: predicated region body
PF: predicated region fallthrough
CT: control target
= control target key end

     0   :  { %s2914_s0 = inlined_call_operand.<no memory space> [shape: f32[1,1], index: 0, kind: input, shape index: {}]   ;;  %s2915_s1 = inlined_call_operand.vmem [shape: f32[128,64], index: 1, kind: input, shape index: {}]   ;;  %s2916_s2 = inlined_call_operand.vmem [shape: f32[128,128], index: 2, kind: input, shape index: {}]   ;;  %s2917_s3 = inlined_call_operand.hbm [shape: f32[64,256], index: 3, kind: input, shape index: {}]   ;;  %s2918_s4 = inlined_call_operand.hbm [shape: f32[128,256], index: 4, kind: output, shape index: {}]  }
   0x1   :  { %9 = sst [smem:[#allocation2]] %s2914_s0 }
   0x2   :  { %10 = vsyncpa [#allocation4], 0 }
   0x3   :  { %12 = vsyncpa [#allocation4 + $0x1], 0 }
   0x4   :  { %13 = vsyncpa [#allocation5], 0 }
   0x5   :  { %15 = vsyncpa [#allocation5 + $0x1], 0  ;;  %s2229_s17 = smov 0   ;;  %s2231_s18 = smov 0  }
   0x6   :  { %s2233_s19 = smov 0   ;;  %s2235_s20 = smov 0  }
   0x7 LB: > { %s2250_s0 = sadd.s32 4294967295, %s2191_s20   ;;  %s1439_s21 = sadd.s32 4294967294, %s2191_s20   ;;  %s2191_s20 = sphi %s2235_s20, %s2932_s20   ;;  %s2187_s19 = sphi %s2233_s19, %s2931_s19   ;;  %s2183_s18 = sphi %s2231_s18, %s2930_s18   ;;  %s2179_s17 = sphi %s2229_s17, %s2929_s17  }
   0x8   : > { %s2254_s22 = sadd.s32 1, %s2191_s20   ;;  %s91_s23 = sadd.s32 1, %s2187_s19 }
   0x9   : > { %s88_s24 = ssub.s32 %s2191_s20, %s2254_s22  ;;  %p98_p0 = scmp.ne.s32.totalorder %s2187_s19, %s2183_s18 }
   0xa   : > { %p89_p1 = scmp.eq.s32.totalorder %s88_s24, 0  ;;  %p99_p2 = scmp.eq.s32.totalorder %s2191_s20, 0 }
   0xb   : > { %p104_p3 = scmp.ne.s32.totalorder %s2183_s18, %s2179_s17  ;;  %p105_p4 = scmp.eq.s32.totalorder %s2250_s0, 0 }
   0xc   : > { %s2266_s25 = scalar_select %p89_p1, %s2187_s19, %s91_s23  }
   0xd   : > { %p2268_p5 = por %p99_p2, %p98_p0  ;;  %p2272_p6 = por %p105_p4, %p104_p3 }
   0xe   : > { %p128_p7 = scmp.eq.s32.totalorder %s2250_s0, 1  ;;  %p134_p8 = scmp.eq.s32.totalorder %s1439_s21, 1 }
   0xf   : > { %p2055_p10 = scmp.lt.s32.totalorder %s2191_s20, 2  ;;  %s163_s30 = sand.u32 1, %s2187_s19  }
  0x10   : > { %p2279_p11 = por %p128_p7, %p98_p0  ;;  %p2283_p12 = por %p134_p8, %p104_p3 }
  0x11   : > { %s1443_s5 = sshll.u32 %s2191_s20, 7  ;;  %s1442_s6 = sshll.u32 %s163_s30, 6 }
  0x12   : > { %s2922_s28 = scalar_select %p2279_p11, 1, 0 }
  0x13   : > { %s2923_s29 = scalar_select %p2283_p12, 1, 0 }
  0x14   : > { %s2292_s9 = scalar_lea.hbm %s2917_s3, %s1443_s5  ;;  %s167_s10 = scalar_lea.vmem [#allocation3], %s1442_s6 }
  0x15   : > { %s173_s11 = sshll.u32 %s167_s10, 4  ;;  %p2296_p13 = pnand %p2055_p10, %p2268_p5  ;;  %s2300_s11 = int_to_ptr.vmem [resolvable:$true] %s173_s11 }
  0x16   : > { %s2303_s13 = scalar_lea.sflag [#allocation4], %s163_s30  ;;  %s2095_s14 = scalar_lea.hbm %s2292_s9, 1024 }
  0x17   : > { %p2096_p1 = scmp.ne.s32.totalorder %s2292_s9, %s2095_s14  ;;  %p2097_p2 = pneg %p2296_p13 }
  0x18   : > { %s2100_s21 = scalar_lea.hbm %s2917_s3, 2048  ;;  %p2101_p5 = scmp.lt.u32.totalorder %s2292_s9, %s2917_s3 }
  0x19   : > { %p2098_p3 = pnand %p2097_p2, %p2096_p1  ;;  %p2102_p7 = scmp.lt.u32.totalorder %s2100_s21, %s2095_s14 }
  0x1a   : > { %p2104_p10 = scmp.lt.u32.totalorder %s2095_s14, %s2292_s9 }
  0x1b   : > { %p2099_p4 = pneg %p2098_p3  ;;  %p2103_p8 = por %p2102_p7, %p2101_p5 }
  0x1d   : > { %p2105_p9 = por %p2104_p10, %p2103_p8 }
  0x1f   : > { %p2106_p0 = pnand %p2105_p9, %p2099_p4 }
  0x21   : > { %2109 = shalt.err (!%p2106_p0)
}
  0x22   : > { %s2110_s26 = scalar_lea.vmem %s2300_s11, 1024  ;;  %s2193_s30 = smov [#allocation3]  }
  0x23   : > { %p2111_p1 = scmp.ne.s32.totalorder %s2300_s11, %s2110_s26  ;;  %s2115_s5 = sshll.u32 %s2193_s30, 4  ;;  %s2116_s5 = int_to_ptr.vmem [resolvable:$false] %s2115_s5 }
  0x24   : > { %s2117_s6 = scalar_lea.vmem %s2116_s5, 2048  ;;  %p2118_p11 = scmp.lt.s32.totalorder %s2300_s11, %s2116_s5 }
  0x25   : > { %p2113_p3 = pnand %p2111_p1, %p2097_p2  ;;  %p2119_p5 = scmp.lt.s32.totalorder %s2117_s6, %s2110_s26 }
  0x27   : > { %p2114_p12 = pneg %p2113_p3  ;;  %p2120_p7 = por %p2119_p5, %p2118_p11 }
  0x29   : > { %p2121_p8 = pnand %p2120_p7, %p2114_p12 }
  0x2b   : > { %2124 = shalt.err (!%p2121_p8)
}
  0x2c   : > { %s2194_s7 = smov 256   ;;  %s2195_s8 = smov 128  }
  0x2d   : > { %s2196_s10 = smov 8   ;;  %p181_p9 = scmp.lt.s32.totalorder %s2191_s20, 3 }
  0x2e   : > { %2050 = dma.hbm_to_vmem [thread:$0]  (!%p2296_p13), %s2292_s9, 1024, %s2300_s11, %s2303_s13, %s2194_s7, %s2195_s8, %s2196_s10  }
  0x2f   : > { %p2925_p0 = scmp.ge.s32.totalorder %s2191_s20, 1 }
  0x31   : > { %p182_p2 = pnand %p2925_p0, %p181_p9 }
  0x32   : > { %s2335_s14 = sand.u32 (!%p182_p2), 1, %s2183_s18  }
  0x33   : > { %185 = sbr.rel (%p182_p2) target bundleno = 1353 (0x549), region = 36  ;;  %s1445_s15 = sshll.u32 (!%p182_p2), %s2335_s14, 6 }
  0x34   : > { %s188_s16 = scalar_lea.sflag (!%p182_p2), [#allocation4], %s2335_s14  ;;  %s191_s21 = scalar_lea.vmem (!%p182_p2), [#allocation3], %s1445_s15 }
  0x3a   : > { %2170 = dma.done.wait (%p2272_p6), %s188_s16, 1024  }
  0x3b   : > { %2172 = vsyncadd (%p2272_p6), %s188_s16, 4294966272  ;;  %v251_v0 = vld [vmem:[%s191_s21] sm:$0xff]  ;;  %v252_v1 = vld [vmem:[%s191_s21 + $0x8] sm:$0xff]  ;;  %vm259_vm0 = vcmask 523264   ;;  %s216_s9 = sld [smem:[#allocation2]]  ;;  %s1446_s15 = sshll.u32 %s2335_s14, 7 }
  0x3c   : > { %v253_v2 = vld [vmem:[%s191_s21 + $0x10] sm:$0xff]  ;;  %v1883_v3 = vpack.c.bf16 %v252_v1, %v251_v0  ;;  %v254_v4 = vld [vmem:[%s191_s21 + $0x18] sm:$0xff]  ;;  %v255_v6 = vld [vmem:[%s191_s21 + $0x20] sm:$0xff]  ;;  %s2817_s16 = scalar_lea.vmem [#allocation6], %s1446_s15  ;;  %p2926_p11 = scmp.ne.s32.totalorder %s2922_s28, 0 }
  0x3d   : > { %v1887_v5 = vpack.c.bf16 %v254_v4, %v253_v2  ;;  %v256_v7 = vld [vmem:[%s191_s21 + $0x28] sm:$0xff]  ;;  %v219_v8 = vld [vmem:[%s2915_s1] sm:$0xff]  ;;  %v257_v10 = vld [vmem:[%s191_s21 + $0x30] sm:$0xff]  ;;  %s2197_s23 = smov [#allocation6]  }
  0x3e   : > { %1884 = vmatprep.subr.bf16.mxu0 %v1883_v3  ;;  %1635 = vmatprep.mubr.msk.f32.mxu0 %vm259_vm0, %v219_v8  ;;  %v1891_v9 = vpack.c.bf16 %v256_v7, %v255_v6  ;;  %v258_v11 = vld [vmem:[%s191_s21 + $0x38] sm:$0xff]  ;;  %v220_v13 = vld [vmem:[%s2915_s1 + $0x8] sm:$0xff]  ;;  %v221_v14 = vld [vmem:[%s2915_s1 + $0x10] sm:$0xff]  ;;  %s1464_s21 = sshll.u32 %s2250_s0, 7  ;;  %s1354_s0 = scalar_lea.sflag [#allocation5], %s2335_s14 }
  0x3f   : > { %1886 = vmatpush3.bf16.msra.mxu0 %v1883_v3  ;;  %v1895_v12 = vpack.c.bf16 %v258_v11, %v257_v10  ;;  %v222_v15 = vld [vmem:[%s2915_s1 + $0x18] sm:$0xff]  ;;  %v223_v16 = vld [vmem:[%s2915_s1 + $0x20] sm:$0xff]  ;;  %v224_v17 = vld [vmem:[%s2915_s1 + $0x28] sm:$0xff]  ;;  %s2866_s12 = scalar_lea.hbm %s2918_s4, %s1464_s21  ;;  %s2129_s24 = sshll.u32 %s2197_s23, 4  ;;  %s2130_s24 = int_to_ptr.vmem [resolvable:$false] %s2129_s24 }
  0x40   : > { %1888 = vmatprep.subr.bf16.mxu0 %v1887_v5  ;;  %v225_v18 = vld [vmem:[%s2915_s1 + $0x30] sm:$0xff]  ;;  %v226_v19 = vld [vmem:[%s2915_s1 + $0x38] sm:$0xff]  ;;  %v227_v20 = vld [vmem:[%s2915_s1 + $0x40] sm:$0xff]  ;;  %s2131_s26 = scalar_lea.vmem %s2130_s24, 4096 }
  0x41   : > { %v228_v21 = vld [vmem:[%s2915_s1 + $0x48] sm:$0xff]  ;;  %v229_v22 = vld [vmem:[%s2915_s1 + $0x50] sm:$0xff]  ;;  %v230_v23 = vld [vmem:[%s2915_s1 + $0x58] sm:$0xff]  ;;  %v2414_v29 = vstv %s216_s9  ;;  %s1366_s9 = sshll.u32 %s2817_s16, 4  ;;  %s2868_s9 = int_to_ptr.vmem [resolvable:$true] %s1366_s9 }
  0x42   : > { %v231_v24 = vld [vmem:[%s2915_s1 + $0x60] sm:$0xff]  ;;  %v232_v25 = vld [vmem:[%s2915_s1 + $0x68] sm:$0xff]  ;;  %v233_v26 = vld [vmem:[%s2915_s1 + $0x70] sm:$0xff]  ;;  %v2417_v30 = vsub.f32 0.0, %v2414_v29  ;;  %s2125_s13 = scalar_lea.vmem %s2868_s9, 2048  ;;  %p2132_p4 = scmp.lt.s32.totalorder %s2868_s9, %s2130_s24 }
  0x43   : > { %1890 = vmatpush3.bf16.msra.mxu0 %v1887_v5  ;;  %v234_v27 = vld [vmem:[%s2915_s1 + $0x78] sm:$0xff]  ;;  %v2410_v28 = vld [vmem:[%s2916_s2] sm:$0xff]  ;;  %p2126_p6 = scmp.ne.s32.totalorder %s2868_s9, %s2125_s13  ;;  %p2133_p10 = scmp.lt.s32.totalorder %s2131_s26, %s2125_s13 }
  0x44   : > { %1892 = vmatprep.subr.bf16.mxu0 %v1891_v9  ;;  %1691 = vmatprep.mubr.f32.mxu1 %v2410_v28 }
  0x45   : > { %p2127_p12 = pnand %p2126_p6, %p2926_p11  ;;  %p2134_p1 = por %p2133_p10, %p2132_p4 }
  0x47   : > { %1894 = vmatpush3.bf16.msra.mxu0 %v1891_v9  ;;  %p2128_p13 = pneg %p2127_p12 }
  0x48   : > { %1896 = vmatprep.subr.bf16.mxu0 %v1895_v12 }
  0x49   : > { %p2135_p3 = pnand %p2134_p1, %p2128_p13 }
  0x4b   : > { %1898 = vmatpush3.bf16.msra.mxu0 %v1895_v12 }
  0x4e   : > { %1636 = vmatmul.mubr.msk.f32.vlgmr.msra.gmra.mrb[0].mxu0 %vm259_vm0, %v220_v13 }
  0x4f   : > { %1638 = vmatprep.mubr.msk.f32.mxu0 %vm259_vm0, %v221_v14 }
  0x52   : > { %1639 = vmatmul.mubr.msk.f32.gmra.mrb[2].mxu0 %vm259_vm0, %v222_v15 }
  0x53   : > { %1641 = vmatprep.mubr.msk.f32.mxu0 %vm259_vm0, %v223_v16 }
  0x56   : > { %1642 = vmatmul.mubr.msk.f32.gmra.mrb[4].mxu0 %vm259_vm0, %v224_v17 }
  0x57   : > { %1644 = vmatprep.mubr.msk.f32.mxu0 %vm259_vm0, %v225_v18 }
  0x5a   : > { %1645 = vmatmul.mubr.msk.f32.gmra.mrb[6].mxu0 %vm259_vm0, %v226_v19 }
  0x5b   : > { %1647 = vmatprep.mubr.msk.f32.mxu0 %vm259_vm0, %v227_v20 }
  0x5e   : > { %1648 = vmatmul.mubr.msk.f32.gmra.mrb[8].mxu0 %vm259_vm0, %v228_v21 }
  0x5f   : > { %1650 = vmatprep.mubr.msk.f32.mxu0 %vm259_vm0, %v229_v22 }
  0x62   : > { %1651 = vmatmul.mubr.msk.f32.gmra.mrb[10].mxu0 %vm259_vm0, %v230_v23 }
  0x63   : > { %1653 = vmatprep.mubr.msk.f32.mxu0 %vm259_vm0, %v231_v24 }
  0x66   : > { %1654 = vmatmul.mubr.msk.f32.gmra.mrb[12].mxu0 %vm259_vm0, %v232_v25 }
  0x67   : > { %1656 = vmatprep.mubr.msk.f32.mxu0 %vm259_vm0, %v233_v26 }
  0x6a   : > { %1657 = vmatmul.mubr.msk.f32.gmra.mrb[14].mxu0 %vm259_vm0, %v234_v27 }
  0x6b   : > { %1747 = vmatprep.mubr.f32.mxu0 %v2410_v28 }
 0x121   : > { %v2419_v31 = vpop.f32.mrb[0].mxu0 }
 0x122   : > { %v2421_v32 = vpop.f32.mrb[1].mxu0  ;;  %v454_v33 = vmax.f32 %v2419_v31, %v2417_v30 }
 0x123   : > { %v453_v34 = vmax.f32 %v2421_v32, %v2417_v30 }
 0x124   : > { %v470_v35 = vmin.f32 %v454_v33, %v2414_v29 }
 0x125   : > { %v2428_v36 = vpop.f32.mrb[2].mxu0  ;;  %v469_v37 = vmin.f32 %v453_v34, %v2414_v29 }
 0x126   : > { %v2431_v38 = vpop.f32.mrb[3].mxu0  ;;  %v486_v39 = vsub.f32 %v2419_v31, %v470_v35  ;;  %v456_v40 = vmax.f32 %v2428_v36, %v2417_v30 }
 0x127   : > { %v485_v41 = vsub.f32 %v2421_v32, %v469_v37  ;;  %v455_v42 = vmax.f32 %v2431_v38, %v2417_v30 }
 0x128   : > { %v472_v43 = vmin.f32 %v456_v40, %v2414_v29 }
 0x129   : > { %v2440_v44 = vpop.f32.mrb[4].mxu0  ;;  %v1899_v45 = vpack.c.bf16 %v486_v39, %v485_v41  ;;  %v471_v46 = vmin.f32 %v455_v42, %v2414_v29 }
 0x12a   : > { %v2443_v47 = vpop.f32.mrb[5].mxu0  ;;  %v488_v48 = vsub.f32 %v2428_v36, %v472_v43  ;;  %v458_v49 = vmax.f32 %v2440_v44, %v2417_v30 }
 0x12b   : > { %1900 = vmatprep.subr.bf16.mxu1 %v1899_v45  ;;  %v487_v50 = vsub.f32 %v2431_v38, %v471_v46  ;;  %v457_v51 = vmax.f32 %v2443_v47, %v2417_v30 }
 0x12c   : > { %1902 = vmatpush3.bf16.msra.mxu1 %v1899_v45  ;;  %v474_v52 = vmin.f32 %v458_v49, %v2414_v29  ;;  %v2523_v49 = vld [vmem:[%s2916_s2 + $0x10] sm:$0xff] }
 0x12d   : > { %v2452_v53 = vpop.f32.mrb[6].mxu0  ;;  %v1903_v54 = vpack.c.bf16 %v488_v48, %v487_v50  ;;  %v473_v55 = vmin.f32 %v457_v51, %v2414_v29  ;;  %v2518_v48 = vld [vmem:[%s2916_s2 + $0x8] sm:$0xff]  ;;  %v2530_v50 = vld [vmem:[%s2916_s2 + $0x18] sm:$0xff]  ;;  %v2535_v51 = vld [vmem:[%s2916_s2 + $0x20] sm:$0xff] }
 0x12e   : > { %v2455_v56 = vpop.f32.mrb[7].mxu0  ;;  %v490_v57 = vsub.f32 %v2440_v44, %v474_v52  ;;  %v460_v58 = vmax.f32 %v2452_v53, %v2417_v30  ;;  %v2542_v52 = vld [vmem:[%s2916_s2 + $0x28] sm:$0xff] }
 0x12f   : > { %1904 = vmatprep.subr.bf16.mxu1 %v1903_v54  ;;  %v489_v59 = vsub.f32 %v2443_v47, %v473_v55  ;;  %v459_v60 = vmax.f32 %v2455_v56, %v2417_v30  ;;  %v2554_v55 = vld [vmem:[%s2916_s2 + $0x38] sm:$0xff] }
 0x130   : > { %1906 = vmatpush3.bf16.msra.mxu1 %v1903_v54  ;;  %v476_v61 = vmin.f32 %v460_v58, %v2414_v29  ;;  %v2547_v54 = vld [vmem:[%s2916_s2 + $0x30] sm:$0xff]  ;;  %v2566_v58 = vld [vmem:[%s2916_s2 + $0x48] sm:$0xff] }
 0x131   : > { %v2464_v62 = vpop.f32.mrb[8].mxu0  ;;  %v1907_v63 = vpack.c.bf16 %v490_v57, %v489_v59  ;;  %v475_v0 = vmin.f32 %v459_v60, %v2414_v29  ;;  %v2559_v57 = vld [vmem:[%s2916_s2 + $0x40] sm:$0xff]  ;;  %v2571_v59 = vld [vmem:[%s2916_s2 + $0x50] sm:$0xff]  ;;  %v2578_v60 = vld [vmem:[%s2916_s2 + $0x58] sm:$0xff] }
 0x132   : > { %v2467_v1 = vpop.f32.mrb[9].mxu0  ;;  %v492_v2 = vsub.f32 %v2452_v53, %v476_v61  ;;  %v462_v3 = vmax.f32 %v2464_v62, %v2417_v30  ;;  %v2583_v61 = vld [vmem:[%s2916_s2 + $0x60] sm:$0xff] }
 0x133   : > { %1908 = vmatprep.subr.bf16.mxu1 %v1907_v63  ;;  %v491_v4 = vsub.f32 %v2455_v56, %v475_v0  ;;  %v461_v5 = vmax.f32 %v2467_v1, %v2417_v30  ;;  %v2595_v0 = vld [vmem:[%s2916_s2 + $0x70] sm:$0xff] }
 0x134   : > { %1910 = vmatpush3.bf16.msra.mxu1 %v1907_v63  ;;  %v478_v6 = vmin.f32 %v462_v3, %v2414_v29  ;;  %v2590_v63 = vld [vmem:[%s2916_s2 + $0x68] sm:$0xff] }
 0x135   : > { %v2476_v7 = vpop.f32.mrb[10].mxu0  ;;  %v1911_v8 = vpack.c.bf16 %v492_v2, %v491_v4  ;;  %v477_v9 = vmin.f32 %v461_v5, %v2414_v29  ;;  %v2602_v2 = vld [vmem:[%s2916_s2 + $0x78] sm:$0xff] }
 0x136   : > { %v2479_v10 = vpop.f32.mrb[11].mxu0  ;;  %v494_v11 = vsub.f32 %v2464_v62, %v478_v6  ;;  %v464_v12 = vmax.f32 %v2476_v7, %v2417_v30 }
 0x137   : > { %1912 = vmatprep.subr.bf16.mxu1 %v1911_v8  ;;  %v493_v13 = vsub.f32 %v2467_v1, %v477_v9  ;;  %v463_v14 = vmax.f32 %v2479_v10, %v2417_v30 }
 0x138   : > { %1914 = vmatpush3.bf16.msra.mxu1 %v1911_v8  ;;  %v480_v15 = vmin.f32 %v464_v12, %v2414_v29 }
 0x139   : > { %v2488_v16 = vpop.f32.mrb[12].mxu0  ;;  %v1915_v17 = vpack.c.bf16 %v494_v11, %v493_v13  ;;  %v479_v18 = vmin.f32 %v463_v14, %v2414_v29 }
 0x13a   : > { %v2491_v19 = vpop.f32.mrb[13].mxu0  ;;  %v496_v20 = vsub.f32 %v2476_v7, %v480_v15  ;;  %v466_v21 = vmax.f32 %v2488_v16, %v2417_v30 }
 0x13b   : > { %1916 = vmatprep.subr.bf16.mxu1 %v1915_v17  ;;  %v495_v22 = vsub.f32 %v2479_v10, %v479_v18  ;;  %v465_v23 = vmax.f32 %v2491_v19, %v2417_v30 }
 0x13c   : > { %1918 = vmatpush3.bf16.msra.mxu1 %v1915_v17  ;;  %v482_v24 = vmin.f32 %v466_v21, %v2414_v29 }
 0x13d   : > { %v2500_v25 = vpop.f32.mrb[14].mxu0  ;;  %v1919_v26 = vpack.c.bf16 %v496_v20, %v495_v22  ;;  %v481_v27 = vmin.f32 %v465_v23, %v2414_v29 }
 0x13e   : > { %v2503_v33 = vpop.f32.mrb[15].mxu0  ;;  %v498_v34 = vsub.f32 %v2488_v16, %v482_v24  ;;  %v468_v35 = vmax.f32 %v2500_v25, %v2417_v30 }
 0x13f   : > { %1920 = vmatprep.subr.bf16.mxu1 %v1919_v26  ;;  %v497_v37 = vsub.f32 %v2491_v19, %v481_v27  ;;  %v467_v39 = vmax.f32 %v2503_v33, %v2417_v30 }
 0x140   : > { %1922 = vmatpush3.bf16.msra.mxu1 %v1919_v26  ;;  %v484_v40 = vmin.f32 %v468_v35, %v2414_v29 }
 0x141   : > { %v1923_v41 = vpack.c.bf16 %v498_v34, %v497_v37  ;;  %v483_v42 = vmin.f32 %v467_v39, %v2414_v29 }
 0x142   : > { %v500_v43 = vsub.f32 %v2500_v25, %v484_v40 }
 0x143   : > { %1924 = vmatprep.subr.bf16.mxu1 %v1923_v41  ;;  %v499_v45 = vsub.f32 %v2503_v33, %v483_v42 }
 0x144   : > { %1926 = vmatpush3.bf16.msra.mxu1 %v1923_v41 }
 0x145   : > { %v1927_v46 = vpack.c.bf16 %v500_v43, %v499_v45 }
 0x147   : > { %1928 = vmatprep.subr.bf16.mxu1 %v1927_v46 }
 0x148   : > { %1930 = vmatpush3.bf16.msra.mxu1 %v1927_v46 }
 0x14b   : > { %1692 = vmatmul.mubr.f32.vlgmr.msra.gmra.mrb[0].mxu1 %v2518_v48 }
 0x14c   : > { %1694 = vmatprep.mubr.f32.mxu1 %v2523_v49 }
 0x14f   : > { %1695 = vmatmul.mubr.f32.gmra.mrb[2].mxu1 %v2530_v50 }
 0x150   : > { %1697 = vmatprep.mubr.f32.mxu1 %v2535_v51 }
 0x153   : > { %1698 = vmatmul.mubr.f32.gmra.mrb[4].mxu1 %v2542_v52 }
 0x154   : > { %1700 = vmatprep.mubr.f32.mxu1 %v2547_v54 }
 0x157   : > { %1701 = vmatmul.mubr.f32.gmra.mrb[6].mxu1 %v2554_v55 }
 0x158   : > { %1703 = vmatprep.mubr.f32.mxu1 %v2559_v57 }
 0x15b   : > { %1704 = vmatmul.mubr.f32.gmra.mrb[8].mxu1 %v2566_v58 }
 0x15c   : > { %1706 = vmatprep.mubr.f32.mxu1 %v2571_v59 }
 0x15f   : > { %1707 = vmatmul.mubr.f32.gmra.mrb[10].mxu1 %v2578_v60 }
 0x160   : > { %1709 = vmatprep.mubr.f32.mxu1 %v2583_v61 }
 0x163   : > { %1710 = vmatmul.mubr.f32.gmra.mrb[12].mxu1 %v2590_v63 }
 0x164   : > { %1712 = vmatprep.mubr.f32.mxu1 %v2595_v0 }
 0x167   : > { %1713 = vmatmul.mubr.f32.gmra.mrb[14].mxu1 %v2602_v2 }
 0x168   : > { %1803 = vmatprep.mubr.f32.mxu1 %v2410_v28 }
 0x21e   : > { %v1693_v3 = vpop.f32.mrb[0].mxu1 }
 0x21f   : > { %v647_v4 = vadd.f32 %v1693_v3, %v2419_v31  ;;  %v567_v5 = vpop.f32.mrb[1].mxu1 }
 0x220   : > { %v646_v6 = vadd.f32 %v567_v5, %v2421_v32 }
 0x221   : > { %v663_v8 = vmax.f32 %v647_v4, %v2417_v30 }
 0x222   : > { %v662_v9 = vmax.f32 %v646_v6, %v2417_v30  ;;  %v1696_v11 = vpop.f32.mrb[2].mxu1 }
 0x223   : > { %v679_v12 = vmin.f32 %v663_v8, %v2414_v29  ;;  %v649_v13 = vadd.f32 %v1696_v11, %v2428_v36  ;;  %v577_v14 = vpop.f32.mrb[3].mxu1 }
 0x224   : > { %v678_v15 = vmin.f32 %v662_v9, %v2414_v29  ;;  %v648_v17 = vadd.f32 %v577_v14, %v2431_v38 }
 0x225   : > { %v695_v18 = vsub.f32 %v647_v4, %v679_v12  ;;  %v665_v20 = vmax.f32 %v649_v13, %v2417_v30 }
 0x226   : > { %v694_v21 = vsub.f32 %v646_v6, %v678_v15  ;;  %v664_v22 = vmax.f32 %v648_v17, %v2417_v30  ;;  %v1699_v23 = vpop.f32.mrb[4].mxu1 }
 0x227   : > { %v681_v24 = vmin.f32 %v665_v20, %v2414_v29  ;;  %v651_v26 = vadd.f32 %v1699_v23, %v2440_v44  ;;  %v587_v27 = vpop.f32.mrb[5].mxu1 }
 0x228   : > { %v680_v34 = vmin.f32 %v664_v22, %v2414_v29  ;;  %v650_v35 = vadd.f32 %v587_v27, %v2443_v47  ;;  %v1931_v37 = vpack.c.bf16 %v695_v18, %v694_v21 }
 0x229   : > { %v697_v39 = vsub.f32 %v649_v13, %v681_v24  ;;  %v667_v40 = vmax.f32 %v651_v26, %v2417_v30 }
 0x22a   : > { %v696_v41 = vsub.f32 %v648_v17, %v680_v34  ;;  %v666_v42 = vmax.f32 %v650_v35, %v2417_v30  ;;  %v1702_v43 = vpop.f32.mrb[6].mxu1  ;;  %1932 = vmatprep.subr.bf16.mxu0 %v1931_v37 }
 0x22b   : > { %v683_v45 = vmin.f32 %v667_v40, %v2414_v29  ;;  %v653_v46 = vadd.f32 %v1702_v43, %v2452_v53  ;;  %v597_v3 = vpop.f32.mrb[7].mxu1  ;;  %1934 = vmatpush3.bf16.msra.mxu0 %v1931_v37 }
 0x22c   : > { %v682_v4 = vmin.f32 %v666_v42, %v2414_v29  ;;  %v652_v5 = vadd.f32 %v597_v3, %v2455_v56  ;;  %v1935_v6 = vpack.c.bf16 %v697_v39, %v696_v41 }
 0x22d   : > { %v699_v8 = vsub.f32 %v651_v26, %v683_v45  ;;  %v669_v9 = vmax.f32 %v653_v46, %v2417_v30 }
 0x22e   : > { %v698_v11 = vsub.f32 %v650_v35, %v682_v4  ;;  %v668_v12 = vmax.f32 %v652_v5, %v2417_v30  ;;  %v1705_v13 = vpop.f32.mrb[8].mxu1  ;;  %1936 = vmatprep.subr.bf16.mxu0 %v1935_v6 }
 0x22f   : > { %v685_v14 = vmin.f32 %v669_v9, %v2414_v29  ;;  %v655_v15 = vadd.f32 %v1705_v13, %v2464_v62  ;;  %v607_v17 = vpop.f32.mrb[9].mxu1  ;;  %1938 = vmatpush3.bf16.msra.mxu0 %v1935_v6 }
 0x230   : > { %v684_v18 = vmin.f32 %v668_v12, %v2414_v29  ;;  %v654_v20 = vadd.f32 %v607_v17, %v2467_v1  ;;  %v1939_v21 = vpack.c.bf16 %v699_v8, %v698_v11 }
 0x231   : > { %v701_v22 = vsub.f32 %v653_v46, %v685_v14  ;;  %v671_v23 = vmax.f32 %v655_v15, %v2417_v30 }
 0x232   : > { %v700_v24 = vsub.f32 %v652_v5, %v684_v18  ;;  %v670_v26 = vmax.f32 %v654_v20, %v2417_v30  ;;  %v1708_v27 = vpop.f32.mrb[10].mxu1  ;;  %1940 = vmatprep.subr.bf16.mxu0 %v1939_v21 }
 0x233   : > { %v687_v34 = vmin.f32 %v671_v23, %v2414_v29  ;;  %v657_v35 = vadd.f32 %v1708_v27, %v2476_v7  ;;  %v617_v37 = vpop.f32.mrb[11].mxu1  ;;  %1942 = vmatpush3.bf16.msra.mxu0 %v1939_v21 }
 0x234   : > { %v686_v39 = vmin.f32 %v670_v26, %v2414_v29  ;;  %v656_v40 = vadd.f32 %v617_v37, %v2479_v10  ;;  %v1943_v41 = vpack.c.bf16 %v701_v22, %v700_v24 }
 0x235   : > { %v703_v42 = vsub.f32 %v655_v15, %v687_v34  ;;  %v673_v43 = vmax.f32 %v657_v35, %v2417_v30 }
 0x236   : > { %v702_v45 = vsub.f32 %v654_v20, %v686_v39  ;;  %v672_v46 = vmax.f32 %v656_v40, %v2417_v30  ;;  %v1711_v3 = vpop.f32.mrb[12].mxu1  ;;  %1944 = vmatprep.subr.bf16.mxu0 %v1943_v41 }
 0x237   : > { %v689_v4 = vmin.f32 %v673_v43, %v2414_v29  ;;  %v659_v5 = vadd.f32 %v1711_v3, %v2488_v16  ;;  %v627_v6 = vpop.f32.mrb[13].mxu1  ;;  %1946 = vmatpush3.bf16.msra.mxu0 %v1943_v41 }
 0x238   : > { %v688_v8 = vmin.f32 %v672_v46, %v2414_v29  ;;  %v658_v9 = vadd.f32 %v627_v6, %v2491_v19  ;;  %v1947_v11 = vpack.c.bf16 %v703_v42, %v702_v45 }
 0x239   : > { %v705_v12 = vsub.f32 %v657_v35, %v689_v4  ;;  %v675_v13 = vmax.f32 %v659_v5, %v2417_v30 }
 0x23a   : > { %v704_v14 = vsub.f32 %v656_v40, %v688_v8  ;;  %v674_v15 = vmax.f32 %v658_v9, %v2417_v30  ;;  %v1714_v17 = vpop.f32.mrb[14].mxu1  ;;  %1948 = vmatprep.subr.bf16.mxu0 %v1947_v11 }
 0x23b   : > { %v691_v18 = vmin.f32 %v675_v13, %v2414_v29  ;;  %v661_v20 = vadd.f32 %v1714_v17, %v2500_v25  ;;  %v637_v21 = vpop.f32.mrb[15].mxu1  ;;  %1950 = vmatpush3.bf16.msra.mxu0 %v1947_v11 }
 0x23c   : > { %v690_v22 = vmin.f32 %v674_v15, %v2414_v29  ;;  %v660_v23 = vadd.f32 %v637_v21, %v2503_v33  ;;  %v1951_v24 = vpack.c.bf16 %v705_v12, %v704_v14 }
 0x23d   : > { %v707_v26 = vsub.f32 %v659_v5, %v691_v18  ;;  %v677_v27 = vmax.f32 %v661_v20, %v2417_v30 }
 0x23e   : > { %v706_v34 = vsub.f32 %v658_v9, %v690_v22  ;;  %v676_v35 = vmax.f32 %v660_v23, %v2417_v30  ;;  %1952 = vmatprep.subr.bf16.mxu0 %v1951_v24 }
 0x23f   : > { %v693_v37 = vmin.f32 %v677_v27, %v2414_v29  ;;  %1954 = vmatpush3.bf16.msra.mxu0 %v1951_v24 }
 0x240   : > { %v692_v39 = vmin.f32 %v676_v35, %v2414_v29  ;;  %v1955_v40 = vpack.c.bf16 %v707_v26, %v706_v34 }
 0x241   : > { %v709_v41 = vsub.f32 %v661_v20, %v693_v37 }
 0x242   : > { %v708_v42 = vsub.f32 %v660_v23, %v692_v39  ;;  %1956 = vmatprep.subr.bf16.mxu0 %v1955_v40 }
 0x243   : > { %1958 = vmatpush3.bf16.msra.mxu0 %v1955_v40 }
 0x244   : > { %v1959_v43 = vpack.c.bf16 %v709_v41, %v708_v42 }
 0x246   : > { %1960 = vmatprep.subr.bf16.mxu0 %v1959_v43 }
 0x247   : > { %1962 = vmatpush3.bf16.msra.mxu0 %v1959_v43 }
 0x24a   : > { %1748 = vmatmul.mubr.f32.vlgmr.msra.gmra.mrb[16].mxu0 %v2518_v48 }
 0x24b   : > { %1750 = vmatprep.mubr.f32.mxu0 %v2523_v49 }
 0x24e   : > { %1751 = vmatmul.mubr.f32.gmra.mrb[18].mxu0 %v2530_v50 }
 0x24f   : > { %1753 = vmatprep.mubr.f32.mxu0 %v2535_v51 }
 0x252   : > { %1754 = vmatmul.mubr.f32.gmra.mrb[20].mxu0 %v2542_v52 }
 0x253   : > { %1756 = vmatprep.mubr.f32.mxu0 %v2547_v54 }
 0x256   : > { %1757 = vmatmul.mubr.f32.gmra.mrb[22].mxu0 %v2554_v55 }
 0x257   : > { %1759 = vmatprep.mubr.f32.mxu0 %v2559_v57 }
 0x25a   : > { %1760 = vmatmul.mubr.f32.gmra.mrb[24].mxu0 %v2566_v58 }
 0x25b   : > { %1762 = vmatprep.mubr.f32.mxu0 %v2571_v59 }
 0x25e   : > { %1763 = vmatmul.mubr.f32.gmra.mrb[26].mxu0 %v2578_v60 }
 0x25f   : > { %1765 = vmatprep.mubr.f32.mxu0 %v2583_v61 }
 0x262   : > { %1766 = vmatmul.mubr.f32.gmra.mrb[28].mxu0 %v2590_v63 }
 0x263   : > { %1768 = vmatprep.mubr.f32.mxu0 %v2595_v0 }
 0x266   : > { %1769 = vmatmul.mubr.f32.gmra.mrb[30].mxu0 %v2602_v2 }
 0x267   : > { %1859 = vmatprep.mubr.f32.mxu0 %v2410_v28 }
 0x31d   : > { %v1749_v45 = vpop.f32.mrb[16].mxu0 }
 0x31e   : > { %v856_v46 = vadd.f32 %v1749_v45, %v2419_v31  ;;  %v776_v3 = vpop.f32.mrb[17].mxu0 }
 0x31f   : > { %v855_v4 = vadd.f32 %v776_v3, %v2421_v32 }
 0x320   : > { %v872_v5 = vmax.f32 %v856_v46, %v2417_v30 }
 0x321   : > { %v871_v6 = vmax.f32 %v855_v4, %v2417_v30  ;;  %v1752_v8 = vpop.f32.mrb[18].mxu0 }
 0x322   : > { %v888_v9 = vmin.f32 %v872_v5, %v2414_v29  ;;  %v858_v11 = vadd.f32 %v1752_v8, %v2428_v36  ;;  %v786_v12 = vpop.f32.mrb[19].mxu0 }
 0x323   : > { %v887_v13 = vmin.f32 %v871_v6, %v2414_v29  ;;  %v857_v28 = vadd.f32 %v786_v12, %v2431_v38 }
 0x324   : > { %v904_v14 = vsub.f32 %v856_v46, %v888_v9  ;;  %v874_v15 = vmax.f32 %v858_v11, %v2417_v30 }
 0x325   : > { %v903_v17 = vsub.f32 %v855_v4, %v887_v13  ;;  %v873_v18 = vmax.f32 %v857_v28, %v2417_v30  ;;  %v1755_v20 = vpop.f32.mrb[20].mxu0 }
 0x326   : > { %v890_v21 = vmin.f32 %v874_v15, %v2414_v29  ;;  %v860_v22 = vadd.f32 %v1755_v20, %v2440_v44  ;;  %v796_v23 = vpop.f32.mrb[21].mxu0 }
 0x327   : > { %v889_v24 = vmin.f32 %v873_v18, %v2414_v29  ;;  %v859_v26 = vadd.f32 %v796_v23, %v2443_v47  ;;  %v1963_v27 = vpack.c.bf16 %v904_v14, %v903_v17 }
 0x328   : > { %v906_v34 = vsub.f32 %v858_v11, %v890_v21  ;;  %v876_v35 = vmax.f32 %v860_v22, %v2417_v30 }
 0x329   : > { %v905_v37 = vsub.f32 %v857_v28, %v889_v24  ;;  %v875_v39 = vmax.f32 %v859_v26, %v2417_v30  ;;  %v1758_v40 = vpop.f32.mrb[22].mxu0  ;;  %1964 = vmatprep.subr.bf16.mxu1 %v1963_v27 }
 0x32a   : > { %v892_v41 = vmin.f32 %v876_v35, %v2414_v29  ;;  %v862_v42 = vadd.f32 %v1758_v40, %v2452_v53  ;;  %v806_v43 = vpop.f32.mrb[23].mxu0  ;;  %1966 = vmatpush3.bf16.msra.mxu1 %v1963_v27 }
 0x32b   : > { %v891_v45 = vmin.f32 %v875_v39, %v2414_v29  ;;  %v861_v46 = vadd.f32 %v806_v43, %v2455_v56  ;;  %v1967_v3 = vpack.c.bf16 %v906_v34, %v905_v37 }
 0x32c   : > { %v908_v4 = vsub.f32 %v860_v22, %v892_v41  ;;  %v878_v5 = vmax.f32 %v862_v42, %v2417_v30 }
 0x32d   : > { %v907_v6 = vsub.f32 %v859_v26, %v891_v45  ;;  %v877_v8 = vmax.f32 %v861_v46, %v2417_v30  ;;  %v1761_v9 = vpop.f32.mrb[24].mxu0  ;;  %1968 = vmatprep.subr.bf16.mxu1 %v1967_v3 }
 0x32e   : > { %v894_v11 = vmin.f32 %v878_v5, %v2414_v29  ;;  %v864_v12 = vadd.f32 %v1761_v9, %v2464_v62  ;;  %v816_v13 = vpop.f32.mrb[25].mxu0  ;;  %1970 = vmatpush3.bf16.msra.mxu1 %v1967_v3 }
 0x32f   : > { %v893_v28 = vmin.f32 %v877_v8, %v2414_v29  ;;  %v863_v14 = vadd.f32 %v816_v13, %v2467_v1  ;;  %v1971_v15 = vpack.c.bf16 %v908_v4, %v907_v6 }
 0x330   : > { %v910_v17 = vsub.f32 %v862_v42, %v894_v11  ;;  %v880_v18 = vmax.f32 %v864_v12, %v2417_v30 }
 0x331   : > { %v909_v20 = vsub.f32 %v861_v46, %v893_v28  ;;  %v879_v21 = vmax.f32 %v863_v14, %v2417_v30  ;;  %v1764_v22 = vpop.f32.mrb[26].mxu0  ;;  %1972 = vmatprep.subr.bf16.mxu1 %v1971_v15 }
 0x332   : > { %v896_v23 = vmin.f32 %v880_v18, %v2414_v29  ;;  %v866_v24 = vadd.f32 %v1764_v22, %v2476_v7  ;;  %v826_v26 = vpop.f32.mrb[27].mxu0  ;;  %1974 = vmatpush3.bf16.msra.mxu1 %v1971_v15 }
 0x333   : > { %v895_v27 = vmin.f32 %v879_v21, %v2414_v29  ;;  %v865_v34 = vadd.f32 %v826_v26, %v2479_v10  ;;  %v1975_v35 = vpack.c.bf16 %v910_v17, %v909_v20 }
 0x334   : > { %v912_v37 = vsub.f32 %v864_v12, %v896_v23  ;;  %v882_v39 = vmax.f32 %v866_v24, %v2417_v30 }
 0x335   : > { %v911_v40 = vsub.f32 %v863_v14, %v895_v27  ;;  %v881_v41 = vmax.f32 %v865_v34, %v2417_v30  ;;  %v1767_v42 = vpop.f32.mrb[28].mxu0  ;;  %1976 = vmatprep.subr.bf16.mxu1 %v1975_v35 }
 0x336   : > { %v898_v43 = vmin.f32 %v882_v39, %v2414_v29  ;;  %v868_v45 = vadd.f32 %v1767_v42, %v2488_v16  ;;  %v836_v46 = vpop.f32.mrb[29].mxu0  ;;  %1978 = vmatpush3.bf16.msra.mxu1 %v1975_v35 }
 0x337   : > { %v897_v3 = vmin.f32 %v881_v41, %v2414_v29  ;;  %v867_v4 = vadd.f32 %v836_v46, %v2491_v19  ;;  %v1979_v5 = vpack.c.bf16 %v912_v37, %v911_v40 }
 0x338   : > { %v914_v6 = vsub.f32 %v866_v24, %v898_v43  ;;  %v884_v8 = vmax.f32 %v868_v45, %v2417_v30 }
 0x339   : > { %v913_v9 = vsub.f32 %v865_v34, %v897_v3  ;;  %v883_v11 = vmax.f32 %v867_v4, %v2417_v30  ;;  %v1770_v12 = vpop.f32.mrb[30].mxu0  ;;  %1980 = vmatprep.subr.bf16.mxu1 %v1979_v5 }
 0x33a   : > { %v900_v13 = vmin.f32 %v884_v8, %v2414_v29  ;;  %v870_v28 = vadd.f32 %v1770_v12, %v2500_v25  ;;  %v846_v14 = vpop.f32.mrb[31].mxu0  ;;  %1982 = vmatpush3.bf16.msra.mxu1 %v1979_v5 }
 0x33b   : > { %v899_v15 = vmin.f32 %v883_v11, %v2414_v29  ;;  %v869_v17 = vadd.f32 %v846_v14, %v2503_v33  ;;  %v1983_v18 = vpack.c.bf16 %v914_v6, %v913_v9 }
 0x33c   : > { %v916_v20 = vsub.f32 %v868_v45, %v900_v13  ;;  %v886_v21 = vmax.f32 %v870_v28, %v2417_v30 }
 0x33d   : > { %v915_v22 = vsub.f32 %v867_v4, %v899_v15  ;;  %v885_v23 = vmax.f32 %v869_v17, %v2417_v30  ;;  %1984 = vmatprep.subr.bf16.mxu1 %v1983_v18 }
 0x33e   : > { %v902_v24 = vmin.f32 %v886_v21, %v2414_v29  ;;  %1986 = vmatpush3.bf16.msra.mxu1 %v1983_v18 }
 0x33f   : > { %v901_v26 = vmin.f32 %v885_v23, %v2414_v29  ;;  %v1987_v27 = vpack.c.bf16 %v916_v20, %v915_v22 }
 0x340   : > { %v918_v34 = vsub.f32 %v870_v28, %v902_v24 }
 0x341   : > { %v917_v35 = vsub.f32 %v869_v17, %v901_v26  ;;  %1988 = vmatprep.subr.bf16.mxu1 %v1987_v27 }
 0x342   : > { %1990 = vmatpush3.bf16.msra.mxu1 %v1987_v27 }
 0x343   : > { %v1991_v37 = vpack.c.bf16 %v918_v34, %v917_v35 }
 0x345   : > { %1992 = vmatprep.subr.bf16.mxu1 %v1991_v37 }
 0x346   : > { %1994 = vmatpush3.bf16.msra.mxu1 %v1991_v37 }
 0x349   : > { %1804 = vmatmul.mubr.f32.vlgmr.msra.gmra.mrb[16].mxu1 %v2518_v48 }
 0x34a   : > { %1806 = vmatprep.mubr.f32.mxu1 %v2523_v49 }
 0x34d   : > { %1807 = vmatmul.mubr.f32.gmra.mrb[18].mxu1 %v2530_v50 }
 0x34e   : > { %1809 = vmatprep.mubr.f32.mxu1 %v2535_v51 }
 0x351   : > { %1810 = vmatmul.mubr.f32.gmra.mrb[20].mxu1 %v2542_v52 }
 0x352   : > { %1812 = vmatprep.mubr.f32.mxu1 %v2547_v54 }
 0x355   : > { %1813 = vmatmul.mubr.f32.gmra.mrb[22].mxu1 %v2554_v55 }
 0x356   : > { %1815 = vmatprep.mubr.f32.mxu1 %v2559_v57 }
 0x359   : > { %1816 = vmatmul.mubr.f32.gmra.mrb[24].mxu1 %v2566_v58 }
 0x35a   : > { %1818 = vmatprep.mubr.f32.mxu1 %v2571_v59 }
 0x35d   : > { %1819 = vmatmul.mubr.f32.gmra.mrb[26].mxu1 %v2578_v60 }
 0x35e   : > { %1821 = vmatprep.mubr.f32.mxu1 %v2583_v61 }
 0x361   : > { %1822 = vmatmul.mubr.f32.gmra.mrb[28].mxu1 %v2590_v63 }
 0x362   : > { %1824 = vmatprep.mubr.f32.mxu1 %v2595_v0 }
 0x365   : > { %1825 = vmatmul.mubr.f32.gmra.mrb[30].mxu1 %v2602_v2 }
 0x366   : > { %1877 = vmatprep.mubr.f32.mxu1 %v2583_v61 }
 0x41c   : > { %v1805_v39 = vpop.f32.mrb[16].mxu1 }
 0x41d   : > { %v1065_v40 = vadd.f32 %v1805_v39, %v2419_v31  ;;  %v985_v41 = vpop.f32.mrb[17].mxu1 }
 0x41e   : > { %v1064_v42 = vadd.f32 %v985_v41, %v2421_v32 }
 0x41f   : > { %v1081_v43 = vmax.f32 %v1065_v40, %v2417_v30 }
 0x420   : > { %v1080_v45 = vmax.f32 %v1064_v42, %v2417_v30  ;;  %v1808_v46 = vpop.f32.mrb[18].mxu1 }
 0x421   : > { %v1097_v3 = vmin.f32 %v1081_v43, %v2414_v29  ;;  %v1067_v4 = vadd.f32 %v1808_v46, %v2428_v36  ;;  %v995_v5 = vpop.f32.mrb[19].mxu1 }
 0x422   : > { %v1096_v6 = vmin.f32 %v1080_v45, %v2414_v29  ;;  %v1066_v61 = vadd.f32 %v995_v5, %v2431_v38 }
 0x423   : > { %v1113_v8 = vsub.f32 %v1065_v40, %v1097_v3  ;;  %v1083_v9 = vmax.f32 %v1067_v4, %v2417_v30 }
 0x424   : > { %v1112_v11 = vsub.f32 %v1064_v42, %v1096_v6  ;;  %v1082_v12 = vmax.f32 %v1066_v61, %v2417_v30  ;;  %v1811_v13 = vpop.f32.mrb[20].mxu1 }
 0x425   : > { %v1099_v28 = vmin.f32 %v1083_v9, %v2414_v29  ;;  %v1069_v14 = vadd.f32 %v1811_v13, %v2440_v44  ;;  %v1005_v15 = vpop.f32.mrb[21].mxu1 }
 0x426   : > { %v1995_v17 = vpack.c.bf16 %v1113_v8, %v1112_v11  ;;  %v1098_v18 = vmin.f32 %v1082_v12, %v2414_v29  ;;  %v1068_v20 = vadd.f32 %v1005_v15, %v2443_v47 }
 0x427   : > { %v1115_v21 = vsub.f32 %v1067_v4, %v1099_v28  ;;  %v1085_v22 = vmax.f32 %v1069_v14, %v2417_v30 }
 0x428   : > { %v1114_v23 = vsub.f32 %v1066_v61, %v1098_v18  ;;  %v1084_v24 = vmax.f32 %v1068_v20, %v2417_v30  ;;  %v1814_v26 = vpop.f32.mrb[22].mxu1  ;;  %1996 = vmatprep.subr.bf16.mxu0 %v1995_v17  ;;  %2027 = vmatprep.subr.bf16.mxu1 %v1995_v17 }
 0x429   : > { %v1101_v27 = vmin.f32 %v1085_v22, %v2414_v29  ;;  %v1071_v34 = vadd.f32 %v1814_v26, %v2452_v53  ;;  %v1015_v35 = vpop.f32.mrb[23].mxu1  ;;  %1998 = vmatpush3.bf16.msra.mxu0 %v1995_v17  ;;  %2035 = vmatpush3.bf16.msra.mxu1 %v1995_v17 }
 0x42a   : > { %v1999_v37 = vpack.c.bf16 %v1115_v21, %v1114_v23  ;;  %v1100_v39 = vmin.f32 %v1084_v24, %v2414_v29  ;;  %v1070_v40 = vadd.f32 %v1015_v35, %v2455_v56 }
 0x42b   : > { %v1117_v41 = vsub.f32 %v1069_v14, %v1101_v27  ;;  %v1087_v42 = vmax.f32 %v1071_v34, %v2417_v30 }
 0x42c   : > { %v1116_v43 = vsub.f32 %v1068_v20, %v1100_v39  ;;  %v1086_v45 = vmax.f32 %v1070_v40, %v2417_v30  ;;  %v1817_v46 = vpop.f32.mrb[24].mxu1  ;;  %2000 = vmatprep.subr.bf16.mxu0 %v1999_v37  ;;  %2028 = vmatprep.subr.bf16.mxu1 %v1999_v37 }
 0x42d   : > { %v1103_v3 = vmin.f32 %v1087_v42, %v2414_v29  ;;  %v1073_v4 = vadd.f32 %v1817_v46, %v2464_v62  ;;  %v1025_v5 = vpop.f32.mrb[25].mxu1  ;;  %2002 = vmatpush3.bf16.msra.mxu0 %v1999_v37  ;;  %2036 = vmatpush3.bf16.msra.mxu1 %v1999_v37 }
 0x42e   : > { %v2003_v6 = vpack.c.bf16 %v1117_v41, %v1116_v43  ;;  %v1102_v61 = vmin.f32 %v1086_v45, %v2414_v29  ;;  %v1072_v8 = vadd.f32 %v1025_v5, %v2467_v1 }
 0x42f   : > { %v1119_v9 = vsub.f32 %v1071_v34, %v1103_v3  ;;  %v1089_v11 = vmax.f32 %v1073_v4, %v2417_v30 }
 0x430   : > { %v1118_v12 = vsub.f32 %v1070_v40, %v1102_v61  ;;  %v1088_v13 = vmax.f32 %v1072_v8, %v2417_v30  ;;  %v1820_v28 = vpop.f32.mrb[26].mxu1  ;;  %2004 = vmatprep.subr.bf16.mxu0 %v2003_v6  ;;  %2029 = vmatprep.subr.bf16.mxu1 %v2003_v6 }
 0x431   : > { %v1105_v14 = vmin.f32 %v1089_v11, %v2414_v29  ;;  %v1075_v15 = vadd.f32 %v1820_v28, %v2476_v7  ;;  %v1035_v17 = vpop.f32.mrb[27].mxu1  ;;  %2006 = vmatpush3.bf16.msra.mxu0 %v2003_v6  ;;  %2037 = vmatpush3.bf16.msra.mxu1 %v2003_v6 }
 0x432   : > { %v2007_v18 = vpack.c.bf16 %v1119_v9, %v1118_v12  ;;  %v1104_v20 = vmin.f32 %v1088_v13, %v2414_v29  ;;  %v1074_v21 = vadd.f32 %v1035_v17, %v2479_v10 }
 0x433   : > { %v1121_v22 = vsub.f32 %v1073_v4, %v1105_v14  ;;  %v1091_v23 = vmax.f32 %v1075_v15, %v2417_v30 }
 0x434   : > { %v1120_v24 = vsub.f32 %v1072_v8, %v1104_v20  ;;  %v1090_v26 = vmax.f32 %v1074_v21, %v2417_v30  ;;  %v1823_v27 = vpop.f32.mrb[28].mxu1  ;;  %2008 = vmatprep.subr.bf16.mxu0 %v2007_v18  ;;  %2030 = vmatprep.subr.bf16.mxu1 %v2007_v18 }
 0x435   : > { %v1107_v34 = vmin.f32 %v1091_v23, %v2414_v29  ;;  %v1077_v35 = vadd.f32 %v1823_v27, %v2488_v16  ;;  %v1045_v37 = vpop.f32.mrb[29].mxu1  ;;  %2010 = vmatpush3.bf16.msra.mxu0 %v2007_v18  ;;  %2038 = vmatpush3.bf16.msra.mxu1 %v2007_v18 }
 0x436   : > { %v2011_v39 = vpack.c.bf16 %v1121_v22, %v1120_v24  ;;  %v1106_v40 = vmin.f32 %v1090_v26, %v2414_v29  ;;  %v1076_v41 = vadd.f32 %v1045_v37, %v2491_v19 }
 0x437   : > { %v1123_v42 = vsub.f32 %v1075_v15, %v1107_v34  ;;  %v1093_v43 = vmax.f32 %v1077_v35, %v2417_v30 }
 0x438   : > { %v1122_v45 = vsub.f32 %v1074_v21, %v1106_v40  ;;  %v1092_v46 = vmax.f32 %v1076_v41, %v2417_v30  ;;  %v1826_v3 = vpop.f32.mrb[30].mxu1  ;;  %2012 = vmatprep.subr.bf16.mxu0 %v2011_v39  ;;  %2031 = vmatprep.subr.bf16.mxu1 %v2011_v39 }
 0x439   : > { %v1109_v4 = vmin.f32 %v1093_v43, %v2414_v29  ;;  %v1079_v5 = vadd.f32 %v1826_v3, %v2500_v25  ;;  %v1055_v6 = vpop.f32.mrb[31].mxu1  ;;  %2014 = vmatpush3.bf16.msra.mxu0 %v2011_v39  ;;  %2039 = vmatpush3.bf16.msra.mxu1 %v2011_v39 }
 0x43a   : > { %v2015_v61 = vpack.c.bf16 %v1123_v42, %v1122_v45  ;;  %v1108_v8 = vmin.f32 %v1092_v46, %v2414_v29  ;;  %v1078_v9 = vadd.f32 %v1055_v6, %v2503_v33 }
 0x43b   : > { %v1125_v11 = vsub.f32 %v1077_v35, %v1109_v4  ;;  %v1095_v12 = vmax.f32 %v1079_v5, %v2417_v30 }
 0x43c   : > { %v1124_v13 = vsub.f32 %v1076_v41, %v1108_v8  ;;  %v1094_v28 = vmax.f32 %v1078_v9, %v2417_v30  ;;  %2016 = vmatprep.subr.bf16.mxu0 %v2015_v61  ;;  %2032 = vmatprep.subr.bf16.mxu1 %v2015_v61 }
 0x43d   : > { %v1111_v14 = vmin.f32 %v1095_v12, %v2414_v29  ;;  %2018 = vmatpush3.bf16.msra.mxu0 %v2015_v61  ;;  %2040 = vmatpush3.bf16.msra.mxu1 %v2015_v61 }
 0x43e   : > { %v2019_v15 = vpack.c.bf16 %v1125_v11, %v1124_v13  ;;  %v1110_v17 = vmin.f32 %v1094_v28, %v2414_v29 }
 0x43f   : > { %v1127_v18 = vsub.f32 %v1079_v5, %v1111_v14 }
 0x440   : > { %v1126_v20 = vsub.f32 %v1078_v9, %v1110_v17  ;;  %2020 = vmatprep.subr.bf16.mxu0 %v2019_v15  ;;  %2033 = vmatprep.subr.bf16.mxu1 %v2019_v15 }
 0x441   : > { %2022 = vmatpush3.bf16.msra.mxu0 %v2019_v15  ;;  %2041 = vmatpush3.bf16.msra.mxu1 %v2019_v15 }
 0x442   : > { %v2023_v21 = vpack.c.bf16 %v1127_v18, %v1126_v20 }
 0x444   : > { %2024 = vmatprep.subr.bf16.mxu0 %v2023_v21  ;;  %2034 = vmatprep.subr.bf16.mxu1 %v2023_v21 }
 0x445   : > { %2026 = vmatpush3.bf16.msra.mxu0 %v2023_v21  ;;  %2042 = vmatpush3.bf16.msra.mxu1 %v2023_v21 }
 0x448   : > { %1860 = vmatmul.mubr.f32.vlgmr.msra.gmra.mrb[32].mxu0 %v2518_v48  ;;  %1878 = vmatmul.mubr.f32.vlgmr.msra.gmra.mrb[32].mxu1 %v2590_v63 }
 0x449   : > { %1862 = vmatprep.mubr.f32.mxu0 %v2523_v49  ;;  %1880 = vmatprep.mubr.f32.mxu1 %v2595_v0 }
 0x44c   : > { %1863 = vmatmul.mubr.f32.gmra.mrb[34].mxu0 %v2530_v50  ;;  %1881 = vmatmul.mubr.f32.gmra.mrb[34].mxu1 %v2602_v2 }
 0x44d   : > { %1865 = vmatprep.mubr.f32.mxu0 %v2535_v51 }
 0x450   : > { %1866 = vmatmul.mubr.f32.gmra.mrb[36].mxu0 %v2542_v52 }
 0x451   : > { %1868 = vmatprep.mubr.f32.mxu0 %v2547_v54 }
 0x454   : > { %1869 = vmatmul.mubr.f32.gmra.mrb[38].mxu0 %v2554_v55 }
 0x455   : > { %1871 = vmatprep.mubr.f32.mxu0 %v2559_v57 }
 0x458   : > { %1872 = vmatmul.mubr.f32.gmra.mrb[40].mxu0 %v2566_v58 }
 0x459   : > { %1874 = vmatprep.mubr.f32.mxu0 %v2571_v59 }
 0x45c   : > { %1875 = vmatmul.mubr.f32.gmra.mrb[42].mxu0 %v2578_v60 }
 0x51b   : > { %v1861_v48 = vpop.f32.mrb[32].mxu0  ;;  %v1879_v49 = vpop.f32.mrb[32].mxu1 }
 0x51c   : > { %v1274_v50 = vadd.f32 %v1861_v48, %v2419_v31  ;;  %v1286_v51 = vadd.f32 %v1879_v49, %v2488_v16  ;;  %v1194_v63 = vpop.f32.mrb[33].mxu0  ;;  %v1254_v52 = vpop.f32.mrb[33].mxu1 }
 0x51d   : > { %v1273_v54 = vadd.f32 %v1194_v63, %v2421_v32  ;;  %v1285_v55 = vadd.f32 %v1254_v52, %v2491_v19 }
 0x51e   : > { %v1290_v57 = vmax.f32 %v1274_v50, %v2417_v30  ;;  %v1302_v58 = vmax.f32 %v1286_v51, %v2417_v30 }
 0x51f   : > { %v1289_v59 = vmax.f32 %v1273_v54, %v2417_v30  ;;  %v1301_v60 = vmax.f32 %v1285_v55, %v2417_v30  ;;  %v1864_v0 = vpop.f32.mrb[34].mxu0  ;;  %v1882_v2 = vpop.f32.mrb[34].mxu1 }
 0x520   : > { %v1306_v31 = vmin.f32 %v1290_v57, %v2414_v29  ;;  %v1318_v16 = vmin.f32 %v1302_v58, %v2414_v29  ;;  %v1276_v22 = vadd.f32 %v1864_v0, %v2428_v36  ;;  %v1288_v32 = vadd.f32 %v1882_v2, %v2500_v25  ;;  %v1204_v19 = vpop.f32.mrb[35].mxu0  ;;  %v1264_v23 = vpop.f32.mrb[35].mxu1 }
 0x521   : > { %v1305_v24 = vmin.f32 %v1289_v59, %v2414_v29  ;;  %v1317_v26 = vmin.f32 %v1301_v60, %v2414_v29  ;;  %v1275_v27 = vadd.f32 %v1204_v19, %v2431_v38  ;;  %v1287_v34 = vadd.f32 %v1264_v23, %v2503_v33 }
 0x522   : > { %v1322_v35 = vsub.f32 %v1274_v50, %v1306_v31  ;;  %v1334_v37 = vsub.f32 %v1286_v51, %v1318_v16  ;;  %v1292_v39 = vmax.f32 %v1276_v22, %v2417_v30  ;;  %v1304_v40 = vmax.f32 %v1288_v32, %v2417_v30 }
 0x523   : > { %v1321_v41 = vsub.f32 %v1273_v54, %v1305_v24  ;;  %v1333_v36 = vsub.f32 %v1285_v55, %v1317_v26  ;;  %v1291_v25 = vmax.f32 %v1275_v27, %v2417_v30  ;;  %v1303_v42 = vmax.f32 %v1287_v34, %v2417_v30  ;;  %v1867_v43 = vpop.f32.mrb[36].mxu0 }
 0x524   : > { %1338 = vst [vmem:[%s2817_s16 + $0x8] sm:$0xff] %v1322_v35  ;;  %1350 = vst [vmem:[%s2817_s16 + $0x68] sm:$0xff] %v1334_v37  ;;  %v1308_v38 = vmin.f32 %v1292_v39, %v2414_v29  ;;  %v1320_v33 = vmin.f32 %v1304_v40, %v2414_v29  ;;  %v1278_v45 = vadd.f32 %v1867_v43, %v2440_v44  ;;  %v1214_v46 = vpop.f32.mrb[37].mxu0 }
 0x525   : > { %1337 = vst [vmem:[%s2817_s16] sm:$0xff] %v1321_v41  ;;  %1349 = vst [vmem:[%s2817_s16 + $0x60] sm:$0xff] %v1333_v36  ;;  %v1307_v3 = vmin.f32 %v1291_v25, %v2414_v29  ;;  %v1319_v4 = vmin.f32 %v1303_v42, %v2414_v29  ;;  %v1277_v5 = vadd.f32 %v1214_v46, %v2443_v47 }
 0x526   : > { %v1324_v6 = vsub.f32 %v1276_v22, %v1308_v38  ;;  %v1336_v61 = vsub.f32 %v1288_v32, %v1320_v33  ;;  %v1294_v8 = vmax.f32 %v1278_v45, %v2417_v30 }
 0x527   : > { %v1323_v9 = vsub.f32 %v1275_v27, %v1307_v3  ;;  %v1335_v11 = vsub.f32 %v1287_v34, %v1319_v4  ;;  %v1293_v12 = vmax.f32 %v1277_v5, %v2417_v30  ;;  %v1870_v44 = vpop.f32.mrb[38].mxu0 }
 0x528   : > { %1340 = vst [vmem:[%s2817_s16 + $0x18] sm:$0xff] %v1324_v6  ;;  %1352 = vst [vmem:[%s2817_s16 + $0x78] sm:$0xff] %v1336_v61  ;;  %v1310_v13 = vmin.f32 %v1294_v8, %v2414_v29  ;;  %v1280_v28 = vadd.f32 %v1870_v44, %v2452_v53  ;;  %v1224_v14 = vpop.f32.mrb[39].mxu0 }
 0x529   : > { %1339 = vst [vmem:[%s2817_s16 + $0x10] sm:$0xff] %v1323_v9  ;;  %1351 = vst [vmem:[%s2817_s16 + $0x70] sm:$0xff] %v1335_v11  ;;  %v1309_v47 = vmin.f32 %v1293_v12, %v2414_v29  ;;  %v1279_v15 = vadd.f32 %v1224_v14, %v2455_v56 }
 0x52a   : > { %v1326_v17 = vsub.f32 %v1278_v45, %v1310_v13  ;;  %v1296_v18 = vmax.f32 %v1280_v28, %v2417_v30 }
 0x52b   : > { %v1325_v20 = vsub.f32 %v1277_v5, %v1309_v47  ;;  %v1295_v21 = vmax.f32 %v1279_v15, %v2417_v30  ;;  %v1873_v48 = vpop.f32.mrb[40].mxu0 }
 0x52c   : > { %1342 = vst [vmem:[%s2817_s16 + $0x28] sm:$0xff] %v1326_v17  ;;  %v1312_v49 = vmin.f32 %v1296_v18, %v2414_v29  ;;  %v1282_v53 = vadd.f32 %v1873_v48, %v2464_v62  ;;  %v1234_v50 = vpop.f32.mrb[41].mxu0 }
 0x52d   : > { %1341 = vst [vmem:[%s2817_s16 + $0x20] sm:$0xff] %v1325_v20  ;;  %v1311_v51 = vmin.f32 %v1295_v21, %v2414_v29  ;;  %v1281_v56 = vadd.f32 %v1234_v50, %v2467_v1 }
 0x52e   : > { %v1328_v63 = vsub.f32 %v1280_v28, %v1312_v49  ;;  %v1298_v52 = vmax.f32 %v1282_v53, %v2417_v30 }
 0x52f   : > { %v1327_v54 = vsub.f32 %v1279_v15, %v1311_v51  ;;  %v1297_v55 = vmax.f32 %v1281_v56, %v2417_v30  ;;  %v1876_v57 = vpop.f32.mrb[42].mxu0 }
 0x530   : > { %1344 = vst [vmem:[%s2817_s16 + $0x38] sm:$0xff] %v1328_v63  ;;  %v1314_v62 = vmin.f32 %v1298_v52, %v2414_v29  ;;  %v1284_v58 = vadd.f32 %v1876_v57, %v2476_v7  ;;  %v1244_v59 = vpop.f32.mrb[43].mxu0 }
 0x531   : > { %1343 = vst [vmem:[%s2817_s16 + $0x30] sm:$0xff] %v1327_v54  ;;  %v1313_v60 = vmin.f32 %v1297_v55, %v2414_v29  ;;  %v1283_v1 = vadd.f32 %v1244_v59, %v2479_v10 }
 0x532   : > { %v1330_v0 = vsub.f32 %v1282_v53, %v1314_v62  ;;  %v1300_v2 = vmax.f32 %v1284_v58, %v2417_v30 }
 0x533   : > { %v1329_v31 = vsub.f32 %v1281_v56, %v1313_v60  ;;  %v1299_v16 = vmax.f32 %v1283_v1, %v2417_v30 }
 0x534   : > { %1346 = vst [vmem:[%s2817_s16 + $0x48] sm:$0xff] %v1330_v0  ;;  %v1316_v7 = vmin.f32 %v1300_v2, %v2414_v29 }
 0x535   : > { %1345 = vst [vmem:[%s2817_s16 + $0x40] sm:$0xff] %v1329_v31  ;;  %v1315_v22 = vmin.f32 %v1299_v16, %v2414_v29 }
 0x536   : > { %v1332_v10 = vsub.f32 %v1284_v58, %v1316_v7 }
 0x537   : > { %v1331_v32 = vsub.f32 %v1283_v1, %v1315_v22 }
 0x538   : > { %1348 = vst [vmem:[%s2817_s16 + $0x58] sm:$0xff] %v1332_v10 }
 0x539   : > { %1347 = vst [vmem:[%s2817_s16 + $0x50] sm:$0xff] %v1331_v32 }
 0x53a   : > { %2138 = shalt.err (!%p2135_p3)
}
 0x53b   : > { %s2139_s30 = scalar_lea.hbm %s2866_s12, 2048  ;;  %s2143_s7 = scalar_lea.hbm %s2918_s4, 4096 }
 0x53c   : > { %p2140_p5 = scmp.ne.s32.totalorder %s2866_s12, %s2139_s30  ;;  %p2144_p9 = scmp.lt.u32.totalorder %s2866_s12, %s2918_s4 }
 0x53d   : > { %p2145_p0 = scmp.lt.u32.totalorder %s2143_s7, %s2139_s30  ;;  %p2147_p6 = scmp.lt.u32.totalorder %s2139_s30, %s2866_s12 }
 0x53e   : > { %p2141_p7 = pnand %p2140_p5, %p2926_p11 }
 0x53f   : > { %p2146_p2 = por %p2145_p0, %p2144_p9 }
 0x540   : > { %p2142_p8 = pneg %p2141_p7 }
 0x541   : > { %p2148_p12 = por %p2147_p6, %p2146_p2 }
 0x543   : > { %p2149_p13 = pnand %p2148_p12, %p2142_p8 }
 0x545   : > { %2152 = shalt.err (!%p2149_p13)
}
 0x546   : > { %s2198_s15 = smov 128   ;;  %s2199_s16 = smov 256  }
 0x547   : > { %s2200_s21 = smov 8  }
 0x548   : > { %2045 = dma.vmem_to_hbm [thread:$0]  (%p2926_p11), %s2868_s9, 2048, %s2866_s12, %s1354_s0, %s2198_s15, %s2199_s16, %s2200_s21  }
 0x549 PF: > { %s1381_s11 = sand.u32 1, %s2179_s17   ;;  %p2927_p4 = scmp.ne.s32.totalorder %s2923_s29, 0 }
 0x54a   : > { %p2928_p10 = scmp.ge.s32.totalorder %s2191_s20, 2  ;;  %s1382_s27 = scalar_lea.sflag [#allocation5], %s1381_s11 }
 0x54c   : > { %p2052_p1 = pnand %p2928_p10, %p2927_p4 }
 0x54e   : > { %2174 = dma.done.wait (!%p2052_p1), %s1382_s27, 2048  }
 0x54f   : > { %2176 = vsyncadd (!%p2052_p1), %s1382_s27, 4294965248  ;;  %p18_p3 = scmp.ge.s32.totalorder %s2254_s22, 4   ;;  %s2929_s17 = smov %s2183_s18 }
 0x550   : > { %s2930_s18 = smov %s2187_s19  ;;  %s2931_s19 = smov %s2266_s25 }
 0x551   : > { %s2932_s20 = smov %s2254_s22  ;;  %20 = sbr.rel (!%p18_p3) target bundleno = 7 (0x7), region = 81 }
 0x558   :  { %1387 = vsyncpa [#allocation4], 1 }
 0x559   :  { %1389 = vsyncpa [#allocation4 + $0x1], 1 }
 0x55a   :  { %1390 = vsyncpa [#allocation5], 1 }
 0x55b   :  { %1392 = vsyncpa [#allocation5 + $0x1], 1 }

</bundles_post_ra>
